<compile_context>
chip_gen: v5e
topology: v5e:2x2
jax: 0.10.0
libtpu: 0.0.40
codegen_flags: <defaults>
</compile_context>

<pallas_src>
import jax
import jax.numpy as jnp
from jax.experimental import pallas as pl
from jax.experimental.pallas import tpu as pltpu


# ---- packed-parameter buffer layout (rows of the (176, 128) bf16 buffer) ----
W1T_OFF = 0      # rows   0:64,  cols 0:4   = W1.T (64, 4)
W2T_OFF = 64     # rows  64:96,  cols 0:64  = W2.T (32, 64)
W3T_OFF = 96     # rows  96:98,  cols 0:32  = W3.T (2, 32)   (band padded to 16 rows)
B_OFF = 112      # rows 112:176: col 0 = b1 (64), col 1 = b2 (32), col 2 = b3 (2)
P_ROWS = 176     # multiple of 16 (bf16 sublane tiling)
P_COLS = 128


def qnetwork_kernel(x_ref, p_ref, o_ref):
    """x_ref: (4, TB) f32, p_ref: (176, 128) bf16, o_ref: (3, TB) f32."""
    tb = x_ref.shape[1]
    x = x_ref[...]                                               # (4, TB) f32

    # ---- layer 1: depth-4 contraction as 4 VPU FMAs (sublane-broadcast x) ----
    w1t = p_ref[W1T_OFF:W1T_OFF + 64, 0:4].astype(jnp.float32)   # (64, 4)
    b1 = p_ref[B_OFF:B_OFF + 64, 0:1].astype(jnp.float32)        # (64, 1)
    h1 = jnp.broadcast_to(b1, (64, tb))
    for k in range(4):                                           # static unroll
        h1 = h1 + w1t[:, k:k + 1] * x[k:k + 1, :]
    h1 = jnp.maximum(h1, 0.0)                                    # (64, TB) f32

    # ---- layer 2: (32,64) @ (64,TB) MXU, bf16 operands, f32 accumulation ----
    w2t = p_ref[W2T_OFF:W2T_OFF + 32, 0:64]                      # (32, 64) bf16
    b2 = p_ref[B_OFF:B_OFF + 32, 1:2].astype(jnp.float32)        # (32, 1)
    h2 = jnp.dot(w2t, h1.astype(jnp.bfloat16),
                 preferred_element_type=jnp.float32)
    h2 = jnp.maximum(h2 + b2, 0.0)                               # (32, TB) f32

    # ---- layer 3: (8,32) @ (32,TB) MXU (rows 2:8 of the band are zeros) ----
    w3t = p_ref[W3T_OFF:W3T_OFF + 8, 0:32]                       # (8, 32) bf16
    b3 = p_ref[B_OFF:B_OFF + 8, 2:3].astype(jnp.float32)         # (8, 1)
    q8 = jnp.dot(w3t, h2.astype(jnp.bfloat16),
                 preferred_element_type=jnp.float32) + b3        # (8, TB) f32

    # lane-dense store: rows 0:1 = Q-values, row 2 = fused greedy action
    o_ref[0:2, :] = q8[0:2, :]
    o_ref[2:3, :] = (q8[1:2, :] > q8[0:1, :]).astype(jnp.float32)


def pack_params(params):
    """Pack (w1, b1, w2, b2, w3, b3) into one compact (176, 128) bf16 buffer.

    Bands hold the transposed weights (out_features on sublanes, in_features
    on lanes); zero padding is mathematically inert (padded W3 output rows /
    bias rows stay zero and are never read back).
    """
    w1, b1, w2, b2, w3, b3 = params
    p = jnp.zeros((P_ROWS, P_COLS), jnp.float32)
    p = p.at[W1T_OFF:W1T_OFF + 64, 0:4].set(jnp.asarray(w1, jnp.float32).T)
    p = p.at[W2T_OFF:W2T_OFF + 32, 0:64].set(jnp.asarray(w2, jnp.float32).T)
    p = p.at[W3T_OFF:W3T_OFF + 2, 0:32].set(jnp.asarray(w3, jnp.float32).T)
    p = p.at[B_OFF:B_OFF + 64, 0].set(jnp.asarray(b1, jnp.float32).reshape(64))
    p = p.at[B_OFF:B_OFF + 32, 1].set(jnp.asarray(b2, jnp.float32).reshape(32))
    p = p.at[B_OFF:B_OFF + 2, 2].set(jnp.asarray(b3, jnp.float32).reshape(2))
    return p.astype(jnp.bfloat16)


def _cdiv(a, b):
    return -(-a // b)


def _round_up(a, b):
    return _cdiv(a, b) * b


def qnetwork_forward(x, packed_params, *, block_b=512):
    """x: (B, 4) f32.  Returns (q_values (B, 2) f32, greedy_actions (B,) int32)."""
    B = x.shape[0]
    xt = jnp.asarray(x, jnp.float32).T                    # (4, B) feature-major

    if B <= 128:
        tb = B                                            # single block, no padding
    else:
        # >= 2 grid steps so the "parallel" axis shards across both v7x TCs;
        # lane blocks must be 128-aligned, cap at block_b (512 ~ HBM roofline).
        nb = max(_cdiv(B, block_b), 2)
        tb = _round_up(_cdiv(B, nb), 128)
    bp = _round_up(B, tb)
    if bp != B:
        xt = jnp.pad(xt, ((0, 0), (0, bp - B)))
    grid = bp // tb

    out = pl.pallas_call(
        qnetwork_kernel,
        out_shape=jax.ShapeDtypeStruct((3, bp), jnp.float32),
        grid_spec=pltpu.PrefetchScalarGridSpec(
            num_scalar_prefetch=0,
            grid=(grid,),
            in_specs=[
                pl.BlockSpec((4, tb), lambda i: (0, i)),
                # constant index_map -> params DMA'd once, VMEM-resident
                pl.BlockSpec((P_ROWS, P_COLS), lambda i: (0, 0)),
            ],
            out_specs=pl.BlockSpec((3, tb), lambda i: (0, i)),
        ),
        compiler_params=pltpu.CompilerParams(
            dimension_semantics=("parallel",)),
    )(xt, packed_params)

    q = out[0:2, :B].T                                    # (B, 2)
    act = out[2, :B].astype(jnp.int32)                    # (B,)
    return q, act


def init_params(key):
    """Deterministic init mimicking torch.nn.Linear default U(-1/sqrt(in), 1/sqrt(in))."""
    def linear(key, fan_in, fan_out):
        kw, kb = jax.random.split(key)
        bound = 1.0 / float(fan_in) ** 0.5
        w = jax.random.uniform(kw, (fan_in, fan_out), jnp.float32, -bound, bound)
        b = jax.random.uniform(kb, (fan_out,), jnp.float32, -bound, bound)
        return w, b

    k1, k2, k3 = jax.random.split(key, 3)
    w1, b1 = linear(k1, 4, 64)
    w2, b2 = linear(k2, 64, 32)
    w3, b3 = linear(k3, 32, 2)
    return (w1, b1, w2, b2, w3, b3)


def _reference(x, params):
    w1, b1, w2, b2, w3, b3 = params
    h = jnp.maximum(x @ w1 + b1, 0.0)
    h = jnp.maximum(h @ w2 + b2, 0.0)
    return h @ w3 + b3


if __name__ == "__main__":
    key = jax.random.PRNGKey(0)
    kp, kx1, kx2 = jax.random.split(key, 3)
    params = init_params(kp)
    packed = pack_params(params)

    fwd = jax.jit(qnetwork_forward)

    # --- small CartPole-style batch: single-block (latency) path -----------
    B = 8
    x = jax.random.normal(kx1, (B, 4), jnp.float32)
    q, act = jax.block_until_ready(fwd(x, packed))

    ref = _reference(x, params)
    assert q.shape == (B, 2) and act.shape == (B,)
    # bf16 weights / MXU operands -> loosened tolerance vs. the f32 reference.
    assert jnp.allclose(q, ref, atol=2e-2, rtol=2e-2), float(jnp.max(jnp.abs(q - ref)))
    # fused greedy action must match argmax over the kernel's own Q-values exactly
    assert jnp.array_equal(act, jnp.argmax(q, axis=-1).astype(jnp.int32))

    # --- larger batch: tiled feature-major path (grid=(2,), pads 260 -> 512) ---
    B2 = 260
    x2 = jax.random.normal(kx2, (B2, 4), jnp.float32)
    q2, act2 = jax.block_until_ready(fwd(x2, packed))

    ref2 = _reference(x2, params)
    assert q2.shape == (B2, 2) and act2.shape == (B2,)
    assert jnp.allclose(q2, ref2, atol=2e-2, rtol=2e-2), float(jnp.max(jnp.abs(q2 - ref2)))
    assert jnp.array_equal(act2, jnp.argmax(q2, axis=-1).astype(jnp.int32))

    print("KERNEL_OK")
</pallas_src>

<mosaic_0001>
module attributes {stable_mosaic.version = 11 : i64} {
  func.func @qnetwork_kernel(%arg0: i32, %arg1: memref<4x8xf32, #tpu.memory_space<vmem>>, %arg2: memref<176x128xbf16, #tpu.memory_space<vmem>>, %arg3: memref<3x8xf32, #tpu.memory_space<vmem>>) attributes {dimension_semantics = [#tpu.dimension_semantics<parallel>], iteration_bounds = array<i64: 1>, scalar_prefetch = 0 : i64, scratch_operands = 0 : i64, tpu.core_type = #tpu.core_type<tc>, window_params = [{transform_indices = @transform_0, window_bounds = array<i64: 4, 8>}, {pipeline_mode = #tpu.pipeline_mode<synchronous>, transform_indices = @transform_1, window_bounds = array<i64: 176, 128>}, {transform_indices = @transform_2, window_bounds = array<i64: 3, 8>}]} {
    %c0 = arith.constant 0 : index
    %c0_0 = arith.constant 0 : index
    %0 = vector.load %arg1[%c0, %c0_0] : memref<4x8xf32, #tpu.memory_space<vmem>>, vector<4x8xf32>
    %c0_1 = arith.constant 0 : index
    %c0_2 = arith.constant 0 : index
    %1 = vector.load %arg2[%c0_1, %c0_2] : memref<176x128xbf16, #tpu.memory_space<vmem>>, vector<64x4xbf16>
    %2 = arith.extf %1 : vector<64x4xbf16> to vector<64x4xf32>
    %c112 = arith.constant 112 : index
    %c0_3 = arith.constant 0 : index
    %3 = vector.load %arg2[%c112, %c0_3] : memref<176x128xbf16, #tpu.memory_space<vmem>>, vector<64x1xbf16>
    %4 = arith.extf %3 : vector<64x1xbf16> to vector<64x1xf32>
    %5 = vector.shape_cast %4 : vector<64x1xf32> to vector<64x1xf32>
    %6 = vector.broadcast %5 : vector<64x1xf32> to vector<64x8xf32>
    %7 = vector.extract_strided_slice %2 {offsets = [0, 0], sizes = [64, 1], strides = [1, 1]} : vector<64x4xf32> to vector<64x1xf32>
    %8 = vector.extract_strided_slice %0 {offsets = [0, 0], sizes = [1, 8], strides = [1, 1]} : vector<4x8xf32> to vector<1x8xf32>
    %9 = vector.broadcast %7 : vector<64x1xf32> to vector<64x8xf32>
    %10 = vector.broadcast %8 : vector<1x8xf32> to vector<64x8xf32>
    %11 = arith.mulf %9, %10 : vector<64x8xf32>
    %12 = arith.addf %6, %11 : vector<64x8xf32>
    %13 = vector.extract_strided_slice %2 {offsets = [0, 1], sizes = [64, 1], strides = [1, 1]} : vector<64x4xf32> to vector<64x1xf32>
    %14 = vector.extract_strided_slice %0 {offsets = [1, 0], sizes = [1, 8], strides = [1, 1]} : vector<4x8xf32> to vector<1x8xf32>
    %15 = vector.broadcast %13 : vector<64x1xf32> to vector<64x8xf32>
    %16 = vector.broadcast %14 : vector<1x8xf32> to vector<64x8xf32>
    %17 = arith.mulf %15, %16 : vector<64x8xf32>
    %18 = arith.addf %12, %17 : vector<64x8xf32>
    %19 = vector.extract_strided_slice %2 {offsets = [0, 2], sizes = [64, 1], strides = [1, 1]} : vector<64x4xf32> to vector<64x1xf32>
    %20 = vector.extract_strided_slice %0 {offsets = [2, 0], sizes = [1, 8], strides = [1, 1]} : vector<4x8xf32> to vector<1x8xf32>
    %21 = vector.broadcast %19 : vector<64x1xf32> to vector<64x8xf32>
    %22 = vector.broadcast %20 : vector<1x8xf32> to vector<64x8xf32>
    %23 = arith.mulf %21, %22 : vector<64x8xf32>
    %24 = arith.addf %18, %23 : vector<64x8xf32>
    %25 = vector.extract_strided_slice %2 {offsets = [0, 3], sizes = [64, 1], strides = [1, 1]} : vector<64x4xf32> to vector<64x1xf32>
    %26 = vector.extract_strided_slice %0 {offsets = [3, 0], sizes = [1, 8], strides = [1, 1]} : vector<4x8xf32> to vector<1x8xf32>
    %27 = vector.broadcast %25 : vector<64x1xf32> to vector<64x8xf32>
    %28 = vector.broadcast %26 : vector<1x8xf32> to vector<64x8xf32>
    %29 = arith.mulf %27, %28 : vector<64x8xf32>
    %30 = arith.addf %24, %29 : vector<64x8xf32>
    %cst = arith.constant 0.000000e+00 : f32
    %31 = vector.broadcast %cst : f32 to vector<64x8xf32>
    %32 = arith.maximumf %30, %31 : vector<64x8xf32>
    %c64 = arith.constant 64 : index
    %c0_4 = arith.constant 0 : index
    %33 = vector.load %arg2[%c64, %c0_4] : memref<176x128xbf16, #tpu.memory_space<vmem>>, vector<32x64xbf16>
    %c112_5 = arith.constant 112 : index
    %c1 = arith.constant 1 : index
    %34 = vector.load %arg2[%c112_5, %c1] : memref<176x128xbf16, #tpu.memory_space<vmem>>, vector<32x1xbf16>
    %35 = arith.extf %34 : vector<32x1xbf16> to vector<32x1xf32>
    %36 = arith.truncf %32 : vector<64x8xf32> to vector<64x8xbf16>
    %cst_6 = arith.constant dense<0.000000e+00> : vector<32x8xf32>
    %37 = tpu.matmul %33, %36, %cst_6 {dimension_numbers = #tpu.dot_dimension_numbers<[1], [0], [0], [1], [0, 0, 1, 1], [], []>} : vector<32x64xbf16>, vector<64x8xbf16>, vector<32x8xf32> -> vector<32x8xf32>
    %38 = vector.broadcast %35 : vector<32x1xf32> to vector<32x8xf32>
    %39 = arith.addf %37, %38 : vector<32x8xf32>
    %cst_7 = arith.constant 0.000000e+00 : f32
    %40 = vector.broadcast %cst_7 : f32 to vector<32x8xf32>
    %41 = arith.maximumf %39, %40 : vector<32x8xf32>
    %c96 = arith.constant 96 : index
    %c0_8 = arith.constant 0 : index
    %42 = vector.load %arg2[%c96, %c0_8] : memref<176x128xbf16, #tpu.memory_space<vmem>>, vector<8x32xbf16>
    %c112_9 = arith.constant 112 : index
    %c2 = arith.constant 2 : index
    %43 = vector.load %arg2[%c112_9, %c2] : memref<176x128xbf16, #tpu.memory_space<vmem>>, vector<8x1xbf16>
    %44 = arith.extf %43 : vector<8x1xbf16> to vector<8x1xf32>
    %45 = arith.truncf %41 : vector<32x8xf32> to vector<32x8xbf16>
    %cst_10 = arith.constant dense<0.000000e+00> : vector<8x8xf32>
    %46 = tpu.matmul %42, %45, %cst_10 {dimension_numbers = #tpu.dot_dimension_numbers<[1], [0], [0], [1], [0, 0, 1, 1], [], []>} : vector<8x32xbf16>, vector<32x8xbf16>, vector<8x8xf32> -> vector<8x8xf32>
    %47 = vector.broadcast %44 : vector<8x1xf32> to vector<8x8xf32>
    %48 = arith.addf %46, %47 : vector<8x8xf32>
    %49 = vector.extract_strided_slice %48 {offsets = [0, 0], sizes = [2, 8], strides = [1, 1]} : vector<8x8xf32> to vector<2x8xf32>
    %c0_11 = arith.constant 0 : index
    %c0_12 = arith.constant 0 : index
    %50 = vector.load %arg3[%c0_11, %c0_12] : memref<3x8xf32, #tpu.memory_space<vmem>>, vector<2x8xf32>
    tpu.vector_store %arg3[%c0_11, %c0_12], %49 {strides = array<i32>} : memref<3x8xf32, #tpu.memory_space<vmem>>, vector<2x8xf32>,
    %51 = vector.extract_strided_slice %48 {offsets = [1, 0], sizes = [1, 8], strides = [1, 1]} : vector<8x8xf32> to vector<1x8xf32>
    %52 = vector.extract_strided_slice %48 {offsets = [0, 0], sizes = [1, 8], strides = [1, 1]} : vector<8x8xf32> to vector<1x8xf32>
    %53 = arith.cmpf ogt, %51, %52 : vector<1x8xf32>
    %54 = arith.extui %53 : vector<1x8xi1> to vector<1x8xi32>
    %55 = arith.sitofp %54 : vector<1x8xi32> to vector<1x8xf32>
    %c2_13 = arith.constant 2 : index
    %c0_14 = arith.constant 0 : index
    %56 = vector.load %arg3[%c2_13, %c0_14] : memref<3x8xf32, #tpu.memory_space<vmem>>, vector<1x8xf32>
    tpu.vector_store %arg3[%c2_13, %c0_14], %55 {strides = array<i32>} : memref<3x8xf32, #tpu.memory_space<vmem>>, vector<1x8xf32>,
    return
  }
  func.func @transform_0(%arg0: i32) -> (i32, i32) {
    %c0_i32 = arith.constant 0 : i32
    %c0_i32_0 = arith.constant 0 : i32
    return %c0_i32, %arg0 : i32, i32
  }
  func.func @transform_1(%arg0: i32) -> (i32, i32) {
    %c0_i32 = arith.constant 0 : i32
    %c0_i32_0 = arith.constant 0 : i32
    %c0_i32_1 = arith.constant 0 : i32
    return %c0_i32, %c0_i32_0 : i32, i32
  }
  func.func @transform_2(%arg0: i32) -> (i32, i32) {
    %c0_i32 = arith.constant 0 : i32
    %c0_i32_0 = arith.constant 0 : i32
    return %c0_i32, %arg0 : i32, i32
  }
}

</mosaic_0001>

<bundles_post_ra>
// kernel: qnetwork_forward.1
= control target key start
LH: loop header
LB: loop body
LE: loop exit
PB: predicated region body
PF: predicated region fallthrough
CT: control target
= control target key end

     0   :  { %7 = vsyncpa [#allocation3], 0  ;;  %s802_s0 = inlined_call_operand.hbm [shape: f32[4,8], index: 0, kind: input, shape index: {}]   ;;  %s803_s1 = inlined_call_operand.hbm [shape: bf16[176,128], index: 1, kind: input, shape index: {}]   ;;  %s804_s2 = inlined_call_operand.vmem [shape: f32[3,8], index: 2, kind: output, shape index: {}]  }
   0x1   :  { %s14_s11 = sshll.u32 %s802_s0, 4  ;;  %s15_s11 = int_to_ptr.hbm [resolvable:$true] %s14_s11 }
   0x2   :  { %8 = vsyncpa [#allocation5], 0  ;;  %s703_s12 = smov [#allocation2]   ;;  %s24_s16 = sshll.u32 %s803_s1, 4  ;;  %s25_s16 = int_to_ptr.hbm [resolvable:$true] %s24_s16 }
   0x3   :  { %s16_s13 = sshll.u32 %s703_s12, 4  ;;  %s704_s17 = smov [#allocation4]   ;;  %s17_s13 = int_to_ptr.vmem [resolvable:$true] %s16_s13 }
   0x4   :  { %19 = dma.hbm_to_vmem [thread:$0]  %s15_s11, 64, %s17_s13, [#allocation3]  }
   0x5   :  { %s26_s18 = sshll.u32 %s704_s17, 4  ;;  %s705_s19 = smov 64   ;;  %s27_s18 = int_to_ptr.vmem [resolvable:$true] %s26_s18 }
   0x6   :  { %s706_s20 = smov 4  }
   0x7   :  { %32 = dma.hbm_to_vmem [thread:$0]  %s25_s16, 1408, %s27_s18, [#allocation5], %s705_s19, %s705_s19, %s706_s20  }
   0x8   :  { %699 = dma.done.wait [#allocation3], 64  }
   0x9   :  { %700 = vsyncadd [#allocation3], 4294967232 }
   0xa   :  { %701 = dma.done.wait [#allocation5], 1408  }
   0xb   :  { %702 = vsyncadd [#allocation5], 4294965888  ;;  %v707_v0 = vmov 1   ;;  %v708_v1 = vmov 0   ;;  %v709_v2 = vmov 2   ;;  %v502_v3 = vld [vmem:[#allocation4 + $0x18] sm:$0xff]  }
   0xc   :  { %533 = vset.pattern.permute.xlu1 %v707_v0  ;;  %522 = vset.pattern.permute.xlu0 %v708_v1  ;;  %v474_v4 = vunpack.c.l.bf16 %v502_v3  ;;  %v475_v5 = vunpack.c.h.bf16 %v502_v3  ;;  %v506_v6 = vld [vmem:[#allocation4 + $0x50] sm:$0xff]   ;;  %v505_v9 = vld [vmem:[#allocation4 + $0x48] sm:$0xff]   ;;  %v504_v23 = vld [vmem:[#allocation4 + $0x40] sm:$0xff]   ;;  %v710_v24 = vmov 3   ;;  %vm373_vm0 = vcmask 523264  }
   0xd   :  { %545 = vset.pattern.permute.xlu2 %v709_v2  ;;  %v501_v8 = vld [vmem:[#allocation4 + $0x10] sm:$0xff]   ;;  %v490_v10 = vunpack.c.l.bf16 %v506_v6  ;;  %v491_v11 = vunpack.c.h.bf16 %v506_v6  ;;  %v486_v14 = vunpack.c.l.bf16 %v505_v9  ;;  %v487_v15 = vunpack.c.h.bf16 %v505_v9  ;;  %v500_v19 = vld [vmem:[#allocation4 + $0x8] sm:$0xff]   ;;  %v461_v28 = vld [vmem:[#allocation4] sm:$0xff]  }
   0xe   :  { %v534_v7 = vpack.i.bf16 %v475_v5, %v474_v4  ;;  %v470_v12 = vunpack.c.l.bf16 %v501_v8  ;;  %v471_v13 = vunpack.c.h.bf16 %v501_v8  ;;  %v466_v20 = vunpack.c.l.bf16 %v500_v19  ;;  %v503_v32 = vld [vmem:[#allocation4 + $0x38] sm:$0xff]  }
   0xf   :  { %v528_v16 = vpack.i.bf16 %v491_v11, %v490_v10  ;;  %v552_v18 = vpack.i.bf16 %v487_v15, %v486_v14  ;;  %v467_v21 = vunpack.c.h.bf16 %v500_v19  ;;  %v482_v25 = vunpack.c.l.bf16 %v504_v23  ;;  %v42_v40 = vld [vmem:[#allocation2] sm:$0xf] }
  0x10   :  { %535 = vperm.xlu1 %533, %v534_v7   ;;  %524 = vperm.xlu0 %522, %v534_v7   ;;  %v540_v17 = vpack.i.bf16 %v471_v13, %v470_v12  ;;  %v483_v26 = vunpack.c.h.bf16 %v504_v23  ;;  %v462_v29 = vunpack.c.l.bf16 %v461_v28  ;;  %v463_v30 = vunpack.c.h.bf16 %v461_v28 }
  0x11   :  { %547 = vperm.xlu2 %545, %v534_v7   ;;  %v569_v22 = vpack.i.bf16 %v467_v21, %v466_v20  ;;  %v478_v33 = vunpack.c.l.bf16 %v503_v32  ;;  %v479_v34 = vunpack.c.h.bf16 %v503_v32  ;;  %v746_v41 = vperm.slane %v42_v40, 0 }
  0x12   :  { %v580_v27 = vpack.i.bf16 %v483_v26, %v482_v25  ;;  %v596_v31 = vpack.i.bf16 %v463_v30, %v462_v29  ;;  %v752_v53 = vperm.slane %v42_v40, 1  ;;  %v754_v56 = vperm.slane %v42_v40, 2 }
  0x13   :  { %v608_v35 = vpack.i.bf16 %v479_v34, %v478_v33  ;;  %vm413_vm1 = vcmask 261120   ;;  %vm430_vm2 = vcmask 58368   ;;  %vm438_vm3 = vcmask 58369  }
  0x18   :  { %539 = vset.pattern.permute.xlu1 %v708_v1  ;;  %529 = vperm.xlu0 %522, %v528_v16  }
  0x19   :  { %541 = vperm.xlu1 %539, %v540_v17   ;;  %551 = vset.pattern.permute.xlu2 %v708_v1 }
  0x1a   :  { %553 = vperm.xlu2 %551, %v552_v18  }
  0x20   :  { %557 = vset.pattern.permute.xlu0 %v707_v0 }
  0x21   :  { %559 = vperm.xlu0 %557, %v540_v17   ;;  %563 = vset.pattern.permute.xlu1 %v710_v24 }
  0x22   :  { %565 = vperm.xlu1 %563, %v534_v7   ;;  %570 = vperm.xlu2 %551, %v569_v22  }
  0x29   :  { %586 = vperm.xlu0 %557, %v569_v22  }
  0x2a   :  { %574 = vset.pattern.permute.xlu1 %v709_v2  ;;  %581 = vperm.xlu2 %551, %v580_v27  }
  0x2b   :  { %576 = vperm.xlu1 %574, %v540_v17  }
  0x31   :  { %601 = vset.pattern.permute.xlu0 %v709_v2 }
  0x32   :  { %603 = vperm.xlu0 %601, %v569_v22   ;;  %597 = vperm.xlu2 %551, %v596_v31  }
  0x33   :  { %590 = vset.pattern.permute.xlu1 %v710_v24 }
  0x34   :  { %592 = vperm.xlu1 %590, %v540_v17  }
  0x3a   :  { %631 = vset.pattern.permute.xlu0 %v710_v24  ;;  %613 = vset.pattern.permute.xlu2 %v707_v0 }
  0x3b   :  { %633 = vperm.xlu0 %631, %v596_v31   ;;  %615 = vperm.xlu2 %613, %v596_v31  }
  0x3c   :  { %607 = vset.pattern.permute.xlu1 %v708_v1 }
  0x3d   :  { %609 = vperm.xlu1 %607, %v608_v35  }
  0x43   :  { %625 = vset.pattern.permute.xlu2 %v709_v2  ;;  %650 = vset.pattern.permute.xlu0 %v709_v2 }
  0x44   :  { %627 = vperm.xlu2 %625, %v596_v31  }
  0x45   :  { %619 = vset.pattern.permute.xlu1 %v710_v24 }
  0x46   :  { %621 = vperm.xlu1 %619, %v569_v22  }
  0x4c   :  { %643 = vset.pattern.permute.xlu2 %v707_v0 }
  0x4d   :  { %645 = vperm.xlu2 %643, %v608_v35  }
  0x4e   :  { %637 = vset.pattern.permute.xlu1 %v707_v0  ;;  %v760_v0 = vperm.slane %v42_v40, 3 }
  0x4f   :  { %639 = vperm.xlu1 %637, %v580_v27  }
  0x57   :  { %649 = vset.pattern.permute.xlu1 %v709_v2 }
  0x6b   :  { %v548_v36 = vpop.permute.xlu2 %547 }
  0x6c   :  { %v550_v57 = vunpack.i.h.bf16 %v548_v36  ;;  %v549_v58 = vunpack.i.l.bf16 %v548_v36 }
  0x6e   :  { %v260_v2 = vmul.f32 %v549_v58, %v754_v56  ;;  %v261_v3 = vmul.f32 %v550_v57, %v754_v56 }
  0x74   :  { %v744_v37 = vpop.permute.xlu2 %553 }
  0x75   :  { %v556_v23 = vunpack.i.h.bf16 %v744_v37  ;;  %v555_v24 = vunpack.i.l.bf16 %v744_v37 }
  0x7c   :  { %v748_v44 = vpop.permute.xlu2 %570 }
  0x82   :  { %v536_v38 = vpop.permute.xlu1 %535  ;;  %v525_v39 = vpop.permute.xlu0 %524 }
  0x83   :  { %v527_v42 = vunpack.i.h.bf16 %v525_v39  ;;  %v526_v43 = vunpack.i.l.bf16 %v525_v39  ;;  %v538_v51 = vunpack.i.h.bf16 %v536_v38  ;;  %v537_v52 = vunpack.i.l.bf16 %v536_v38 }
  0x84   :  { %v758_v61 = vpop.permute.xlu2 %581 }
  0x85   :  { %v162_v46 = vmul.f32 %v526_v43, %v746_v41  ;;  %v163_v47 = vmul.f32 %v527_v42, %v746_v41  ;;  %v211_v59 = vmul.f32 %v537_v52, %v752_v53  ;;  %v212_v60 = vmul.f32 %v538_v51, %v752_v53 }
  0x8a   :  { %v530_v45 = vpop.permute.xlu0 %529 }
  0x8b   :  { %v532_v48 = vunpack.i.h.bf16 %v530_v45  ;;  %v531_v49 = vunpack.i.l.bf16 %v530_v45  ;;  %v542_v50 = vpop.permute.xlu1 %541 }
  0x8c   :  { %v598_v15 = vpop.permute.xlu2 %597  ;;  %v544_v16 = vunpack.i.h.bf16 %v542_v50  ;;  %v543_v17 = vunpack.i.l.bf16 %v542_v50 }
  0x8d   :  { %v170_v54 = vadd.f32 %v531_v49, %v162_v46  ;;  %v171_v55 = vadd.f32 %v532_v48, %v163_v47  ;;  %v573_v48 = vunpack.i.h.bf16 %v748_v44  ;;  %v572_v49 = vunpack.i.l.bf16 %v748_v44 }
  0x8e   :  { %v160_v25 = vmul.f32 %v543_v17, %v746_v41  ;;  %v161_v26 = vmul.f32 %v544_v16, %v746_v41  ;;  %v600_v50 = vunpack.i.h.bf16 %v598_v15  ;;  %v599_v51 = vunpack.i.l.bf16 %v598_v15 }
  0x8f   :  { %v219_v62 = vadd.f32 %v211_v59, %v170_v54  ;;  %v220_v63 = vadd.f32 %v212_v60, %v171_v55  ;;  %v158_v60 = vmul.f32 %v572_v49, %v746_v41 }
  0x90   :  { %v168_v32 = vadd.f32 %v555_v24, %v160_v25  ;;  %v169_v33 = vadd.f32 %v556_v23, %v161_v26 }
  0x91   :  { %v268_v9 = vadd.f32 %v260_v2, %v219_v62  ;;  %v269_v10 = vadd.f32 %v261_v3, %v220_v63  ;;  %v159_v63 = vmul.f32 %v573_v48, %v746_v41  ;;  %v157_v2 = vmul.f32 %v600_v50, %v746_v41 }
  0x93   :  { %v560_v4 = vpop.permute.xlu0 %559 }
  0x94   :  { %v566_v1 = vpop.permute.xlu1 %565  ;;  %v562_v20 = vunpack.i.h.bf16 %v560_v4  ;;  %v561_v21 = vunpack.i.l.bf16 %v560_v4 }
  0x95   :  { %v568_v5 = vunpack.i.h.bf16 %v566_v1  ;;  %v567_v6 = vunpack.i.l.bf16 %v566_v1  ;;  %v616_v31 = vpop.permute.xlu2 %615  ;;  %v156_v1 = vmul.f32 %v599_v51, %v746_v41 }
  0x96   :  { %v209_v29 = vmul.f32 %v561_v21, %v752_v53  ;;  %v210_v30 = vmul.f32 %v562_v20, %v752_v53  ;;  %v618_v55 = vunpack.i.h.bf16 %v616_v31  ;;  %v617_v57 = vunpack.i.l.bf16 %v616_v31 }
  0x97   :  { %v309_v7 = vmul.f32 %v567_v6, %v760_v0  ;;  %v310_v8 = vmul.f32 %v568_v5, %v760_v0 }
  0x98   :  { %v217_v38 = vadd.f32 %v209_v29, %v168_v32  ;;  %v218_v37 = vadd.f32 %v210_v30, %v169_v33 }
  0x99   :  { %v317_v11 = vadd.f32 %v309_v7, %v268_v9  ;;  %v318_v12 = vadd.f32 %v310_v8, %v269_v10  ;;  %v205_v8 = vmul.f32 %v617_v57, %v752_v53  ;;  %v206_v9 = vmul.f32 %v618_v55, %v752_v53 }
  0x9b   :  { %v325_v13 = vmax.f32 %v317_v11, 0.0  ;;  %v326_v14 = vmax.f32 %v318_v12, 0.0  ;;  %v587_v22 = vpop.permute.xlu0 %586 }
  0x9c   :  { %v589_v44 = vunpack.i.h.bf16 %v587_v22  ;;  %v588_v5 = vunpack.i.l.bf16 %v587_v22 }
  0x9d   :  { %v577_v18 = vpop.permute.xlu1 %576  ;;  %v342_v19 = vpack.c.bf16 %v326_v14, %v325_v13  ;;  %v584_v13 = vunpack.i.h.bf16 %v758_v61  ;;  %v583_v14 = vunpack.i.l.bf16 %v758_v61 }
  0x9e   :  { %v579_v27 = vunpack.i.h.bf16 %v577_v18  ;;  %v578_v28 = vunpack.i.l.bf16 %v577_v18  ;;  %v628_v62 = vpop.permute.xlu2 %627  ;;  %v207_v18 = vmul.f32 %v588_v5, %v752_v53 }
  0x9f   :  { %384 = vmatpush.bf16.msra.mxu0 %v342_v19  ;;  %509 = vmatpush.bf16.msra.mxu2 %v342_v19  ;;  %v630_v10 = vunpack.i.h.bf16 %v628_v62  ;;  %v629_v11 = vunpack.i.l.bf16 %v628_v62  ;;  %v208_v19 = vmul.f32 %v589_v44, %v752_v53  ;;  %v166_v26 = vadd.f32 %v583_v14, %v158_v60  ;;  %v403_v14 = vld [vmem:[#allocation4 + $0x30] sm:$0xf] }
  0xa0   :  { %v258_v34 = vmul.f32 %v578_v28, %v754_v56  ;;  %v259_v35 = vmul.f32 %v579_v27, %v754_v56  ;;  %v167_v27 = vadd.f32 %v584_v13, %v159_v63 }
  0xa1   :  { %v254_v24 = vmul.f32 %v629_v11, %v754_v56  ;;  %v255_v25 = vmul.f32 %v630_v10, %v754_v56  ;;  %v215_v29 = vadd.f32 %v207_v18, %v166_v26  ;;  %v711_v18 = vmov 0.0  }
  0xa2   :  { %v266_v42 = vadd.f32 %v258_v34, %v217_v38  ;;  %v267_v43 = vadd.f32 %v259_v35, %v218_v37  ;;  %v216_v30 = vadd.f32 %v208_v19, %v167_v27 }
  0xa4   :  { %v604_v45 = vpop.permute.xlu0 %603 }
  0xa5   :  { %v606_v16 = vunpack.i.h.bf16 %v604_v45  ;;  %v605_v17 = vunpack.i.l.bf16 %v604_v45 }
  0xa6   :  { %v593_v36 = vpop.permute.xlu1 %592 }
  0xa7   :  { %v595_v39 = vunpack.i.h.bf16 %v593_v36  ;;  %v594_v40 = vunpack.i.l.bf16 %v593_v36  ;;  %v256_v61 = vmul.f32 %v605_v17, %v754_v56  ;;  %v257_v28 = vmul.f32 %v606_v16, %v754_v56  ;;  %v646_v60 = vpop.permute.xlu2 %645 }
  0xa9   :  { %v307_v46 = vmul.f32 %v594_v40, %v760_v0  ;;  %v308_v47 = vmul.f32 %v595_v39, %v760_v0  ;;  %v264_v38 = vadd.f32 %v256_v61, %v215_v29  ;;  %v265_v37 = vadd.f32 %v257_v28, %v216_v30 }
  0xab   :  { %v315_v52 = vadd.f32 %v307_v46, %v266_v42  ;;  %v316_v54 = vadd.f32 %v308_v47, %v267_v43 }
  0xad   :  { %v323_v58 = vmax.f32 %v315_v52, 0.0  ;;  %v324_v59 = vmax.f32 %v316_v54, 0.0  ;;  %v634_v12 = vpop.permute.xlu0 %633  ;;  %v459_v52 = vld [vmem:[#allocation4 + $0x28] sm:$0xff]  ;;  %v458_v54 = vld [vmem:[#allocation4 + $0x20] sm:$0xff] }
  0xae   :  { %v636_v20 = vunpack.i.h.bf16 %v634_v12  ;;  %v635_v21 = vunpack.i.l.bf16 %v634_v12 }
  0xaf   :  { %v610_v3 = vpop.permute.xlu1 %609  ;;  %v341_v4 = vpack.c.bf16 %v324_v59, %v323_v58 }
  0xb0   :  { %v612_v6 = vunpack.i.h.bf16 %v610_v3  ;;  %v611_v7 = vunpack.i.l.bf16 %v610_v3  ;;  %v303_v31 = vmul.f32 %v635_v21, %v760_v0  ;;  %v304_v53 = vmul.f32 %v636_v20, %v760_v0 }
  0xb1   :  { %385 = vmatpush.bf16.msra.mxu0 %v341_v4  ;;  %510 = vmatpush.bf16.msra.mxu2 %v341_v4 }
  0xb2   :  { %v164_v41 = vadd.f32 %v611_v7, %v156_v1  ;;  %v165_v15 = vadd.f32 %v612_v6, %v157_v2  ;;  %v648_v1 = vunpack.i.h.bf16 %v646_v60  ;;  %v647_v2 = vunpack.i.l.bf16 %v646_v60 }
  0xb4   :  { %v213_v22 = vadd.f32 %v205_v8, %v164_v41  ;;  %v214_v23 = vadd.f32 %v206_v9, %v165_v15 }
  0xb6   :  { %v262_v33 = vadd.f32 %v254_v24, %v213_v22  ;;  %v263_v34 = vadd.f32 %v255_v25, %v214_v23 }
  0xb8   :  { %v622_v32 = vpop.permute.xlu1 %621  ;;  %v311_v56 = vadd.f32 %v303_v31, %v262_v33  ;;  %v312_v45 = vadd.f32 %v304_v53, %v263_v34 }
  0xb9   :  { %v624_v35 = vunpack.i.h.bf16 %v622_v32  ;;  %v623_v36 = vunpack.i.l.bf16 %v622_v32 }
  0xba   :  { %v319_v49 = vmax.f32 %v311_v56, 0.0  ;;  %v320_v50 = vmax.f32 %v312_v45, 0.0 }
  0xbb   :  { %v305_v39 = vmul.f32 %v623_v36, %v760_v0  ;;  %v306_v40 = vmul.f32 %v624_v35, %v760_v0  ;;  %v404_v0 = vld [vmem:[#allocation4 + $0x38] sm:$0xf] }
  0xbc   :  { %v339_v51 = vpack.c.bf16 %v320_v50, %v319_v49  ;;  %v405_v55 = vunpack.c.l.bf16 %v404_v0 }
  0xbd   :  { %v313_v42 = vadd.f32 %v305_v39, %v264_v38  ;;  %v314_v43 = vadd.f32 %v306_v40, %v265_v37 }
  0xbe   :  { %410 = vperm.xlu1 %649, %v405_v55  }
  0xbf   :  { %v321_v46 = vmax.f32 %v313_v42, 0.0  ;;  %v322_v47 = vmax.f32 %v314_v43, 0.0 }
  0xc1   :  { %v340_v48 = vpack.c.bf16 %v322_v47, %v321_v46  ;;  %v640_v58 = vpop.permute.xlu1 %639 }
  0xc2   :  { %v641_v62 = vunpack.i.l.bf16 %v640_v58  ;;  %v642_v63 = vunpack.i.h.bf16 %v640_v58 }
  0xc3   :  { %386 = vmatpush.bf16.msra.mxu0 %v340_v48  ;;  %511 = vmatpush.bf16.msra.mxu2 %v340_v48 }
  0xc7   :  { %387 = vmatpush.bf16.msra.mxu0 %v339_v51  ;;  %512 = vmatpush.bf16.msra.mxu2 %v339_v51 }
  0xca   :  { %455 = vmatmul.msk.bf16.vlgmr.msra.gmra.mxu2 %vm373_vm0, %v459_v52  ;;  %454 = vmatmul.msk.bf16.vlgmr.msra.gmra.mxu0 %vm373_vm0, %v458_v54 }
 0x130   :  { %v411_v41 = vpop.permute.xlu1 %410 }
 0x147   :  { %v389_v57 = vpop.f32.mrf.mxu0 }
 0x148   :  { %v390_v5 = vadd.f32 %v647_v2, %v389_v57 }
 0x14a   :  { %v399_v10 = vmax.f32 %v390_v5, 0.0 }
 0x14d   :  { %v394_v59 = vpop.f32.mrf.mxu2 }
 0x14e   :  { %v395_v4 = vadd.f32 %v641_v62, %v394_v59 }
 0x14f   :  { %v391_v3 = vpop.f32.mrf.mxu0 }
 0x150   :  { %v392_v6 = vadd.f32 %v648_v1, %v391_v3  ;;  %v401_v8 = vmax.f32 %v395_v4, 0.0 }
 0x152   :  { %v400_v11 = vmax.f32 %v392_v6, 0.0 }
 0x154   :  { %v406_v13 = vpack.c.bf16 %v400_v11, %v399_v10 }
 0x155   :  { %v396_v44 = vpop.f32.mrf.mxu2 }
 0x156   :  { %v397_v7 = vadd.f32 %v642_v63, %v396_v44 }
 0x158   :  { %v402_v9 = vmax.f32 %v397_v7, 0.0 }
 0x15a   :  { %v407_v12 = vpack.c.bf16 %v402_v9, %v401_v8 }
 0x15c   :  { %423 = vmatpush.bf16.msra.mxu1 %v407_v12 }
 0x160   :  { %424 = vmatpush.bf16.msra.mxu1 %v406_v13 }
 0x163   :  { %456 = vmatmul.msk.bf16.vlgmr.msra.gmra.mxu1 %vm413_vm1, %v403_v14 }
 0x1e0   :  { %v426_v15 = vpop.f32.mrf.mxu1 }
 0x1e1   :  { %v427_v16 = vadd.f32 %v426_v15, %v411_v41 }
 0x1e3   :  { %431 = vst.msk [vmem:[%s804_s2] sm:$0x3] %vm430_vm2, %v427_v16  ;;  %v433_v17 = vrot.slane %v427_v16, 7 }
 0x1e5   :  { %vm435_vm4 = vcmp.gt.f32.partialorder %v427_v16, %v433_v17 }
 0x1e6   :  { %v457_v19 = vsel %vm435_vm4, 1.0, %v711_v18 }
 0x1e7   :  { %439 = vst.msk [vmem:[%s804_s2 + $0x1] sm:$0x2] %vm438_vm3, %v457_v19 }
 0x1e8   :  { %v428_v20 = vpop.f32.mrf.mxu1 }
 0x1e9   :  { %444 = vsyncpa [#allocation3], 1 }
 0x1ea   :  { %445 = vsyncpa [#allocation5], 1 }

</bundles_post_ra>
